<compile_context>
chip_gen: v7x
topology: tpu7x:2x2x1
jax: 0.10.0
libtpu: 0.0.40
codegen_flags: <defaults>
</compile_context>

<pallas_src>
import jax
import jax.numpy as jnp
from jax.experimental import pallas as pl
from jax.experimental.pallas import tpu as pltpu


LANE = 128            # TPU lane width; hidden/output dims padded to this in VMEM.
PALLAS_MIN_BATCH = 1024  # below this, plain XLA fusion beats pallas_call overhead.


def _round_up(n, m):
    return ((n + m - 1) // m) * m


def _cdiv(a, b):
    return (a + b - 1) // b


def mlp_kernel(x_ref, w1_ref, b1_ref, w2_ref, b2_ref, o_ref):
    # x:  [TILE_B, D_in]   w1: [D_in, Hp]   b1: [1, Hp]
    # h:  [TILE_B, Hp]     w2: [Hp, Op]     b2: [1, Op]   out ref: [TILE_B, O]
    #
    # Layer 1: MXU matmul with f32 accumulation; bias + ReLU fused on the
    # accumulator (VPU work hides under the MXU slot at these shapes).
    h = jnp.dot(x_ref[...], w1_ref[...], preferred_element_type=jnp.float32)
    h = jnp.maximum(h + b1_ref[...], 0.0)  # ReLU, f32

    # Layer 2: matmul on the 128-wide padded tile (clean MXU shape), bias add
    # on the padded accumulator, then store only the O (=2) real logit
    # columns -> HBM writeback is 8 B/row instead of 512 B/row.
    out = jnp.dot(h.astype(w2_ref.dtype), w2_ref[...],
                  preferred_element_type=jnp.float32)
    out = out + b2_ref[...]
    o_ref[...] = out[:, : o_ref.shape[-1]].astype(o_ref.dtype)


def prepare_params(w1, b1, w2, b2, use_bf16=False):
    """Pad weights once (hoisted out of the per-call forward path).

    Hidden/output feature dims are zero-padded to the 128-lane width so both
    matmuls run on full MXU tiles. Zero columns of w1 / zero rows of w2 are
    exact no-ops, so the sliced logits are bit-identical to the unpadded math.
    Biases stay f32 even in bf16 mode (bias/ReLU run on the f32 accumulator).
    """
    D_in, H = w1.shape
    O = w2.shape[1]
    Hp = _round_up(H, LANE)
    Op = _round_up(O, LANE)
    mm_dtype = jnp.bfloat16 if use_bf16 else w1.dtype

    w1p = jnp.zeros((D_in, Hp), mm_dtype).at[:, :H].set(w1.astype(mm_dtype))
    b1p = jnp.zeros((1, Hp), jnp.float32).at[:, :H].set(b1.astype(jnp.float32))
    w2p = jnp.zeros((Hp, Op), mm_dtype).at[:H, :O].set(w2.astype(mm_dtype))
    b2p = jnp.zeros((1, Op), jnp.float32).at[:, :O].set(b2.astype(jnp.float32))
    return {"w1p": w1p, "b1p": b1p, "w2p": w2p, "b2p": b2p, "out_dim": O}


def neural_network_forward(x, params, *, force_pallas=False):
    """Fused MLP forward (inference mode: dropout is identity).

    x: [B, D_in]; params from prepare_params(). Returns f32 logits [B, 2].
    """
    w1p, b1p = params["w1p"], params["b1p"]
    w2p, b2p = params["w2p"], params["b2p"]
    O = params["out_dim"]

    B, D_in = x.shape
    assert D_in == w1p.shape[0], "input feature dim mismatch"
    Hp = w1p.shape[1]
    Op = w2p.shape[1]

    # In bf16 mode this halves the HBM read of x; no-op for f32 params.
    x = x.astype(w1p.dtype)

    if B < PALLAS_MIN_BATCH and not force_pallas:
        # Tiny batches: pallas_call fixed cost dwarfs the ~us of work; let XLA
        # fuse the two matmuls directly. Padded weights are exact no-ops.
        h = jnp.maximum(x @ w1p + b1p, 0.0)
        return (h @ w2p + b2p)[:, :O].astype(jnp.float32)

    # Row tile: large enough to amortize the ~0.35 us per-grid-step overhead,
    # small enough that the double-buffered x tile + resident weights +
    # (TILE_B, Hp) f32 intermediate stay far under every generation's scoped
    # VMEM limit (incl. v7x's 32 MiB default) for this module's feature sizes.
    TILE_B = min(2048, _round_up(B, 8))
    # v7x has 2 TensorCores: keep >= 2 grid steps at large batch so the
    # "parallel" axis actually feeds both cores.
    if B >= 2048 and _cdiv(B, TILE_B) < 2:
        TILE_B = _round_up(_cdiv(B, 2), 8)
    grid_b = _cdiv(B, TILE_B)

    out = pl.pallas_call(
        mlp_kernel,
        out_shape=jax.ShapeDtypeStruct((B, O), jnp.float32),
        grid_spec=pltpu.PrefetchScalarGridSpec(
            num_scalar_prefetch=0,
            grid=(grid_b,),
            in_specs=[
                # x tiled over batch rows; ragged last block is masked by
                # Pallas (no wrapper-side padding copy of x).
                pl.BlockSpec((TILE_B, D_in), lambda i: (i, 0)),
                # Weights/biases: same block every step -> VMEM-resident.
                pl.BlockSpec((D_in, Hp), lambda i: (0, 0)),
                pl.BlockSpec((1, Hp), lambda i: (0, 0)),
                pl.BlockSpec((Hp, Op), lambda i: (0, 0)),
                pl.BlockSpec((1, Op), lambda i: (0, 0)),
            ],
            # Output block is only O (=2) lanes wide: masked vst per tile is
            # negligible vs. the 64x HBM-byte savings of not writing padding.
            out_specs=pl.BlockSpec((TILE_B, O), lambda i: (i, 0)),
        ),
        compiler_params=pltpu.CompilerParams(
            # Batch rows are independent: shard grid steps across TensorCores
            # on v7x (harmless on single-TC v5e/v6e).
            dimension_semantics=("parallel",)),
    )(x, w1p, b1p, w2p, b2p)
    return out


def init_params(key, input_dim, hidden_ratio):
    """Deterministic init mirroring nn.Linear default (uniform +-1/sqrt(fan_in))."""
    hidden_dim = int(input_dim * hidden_ratio)
    k1, k2, k3, k4 = jax.random.split(key, 4)
    bound1 = 1.0 / (input_dim ** 0.5)
    bound2 = 1.0 / (hidden_dim ** 0.5)
    w1 = jax.random.uniform(k1, (input_dim, hidden_dim), jnp.float32, -bound1, bound1)
    b1 = jax.random.uniform(k2, (1, hidden_dim), jnp.float32, -bound1, bound1)
    w2 = jax.random.uniform(k3, (hidden_dim, 2), jnp.float32, -bound2, bound2)
    b2 = jax.random.uniform(k4, (1, 2), jnp.float32, -bound2, bound2)
    return w1, b1, w2, b2


if __name__ == "__main__":
    # config_hp = {'dropout': 0.1, 'input_hidden_layer_dim_ratio': 0.5}
    input_dim = 32
    hidden_ratio = 0.5

    key = jax.random.PRNGKey(0)
    kx, kx2, kp = jax.random.split(key, 3)
    w1, b1, w2, b2 = init_params(kp, input_dim, hidden_ratio)
    params = prepare_params(w1, b1, w2, b2)  # pad once, reuse per call

    def reference(xv):
        # Plain-JAX reference (dropout is identity in eval mode).
        return jnp.maximum(xv @ w1 + b1, 0.0) @ w2 + b2

    # 1) Small exact-tile batch, forced through the Pallas kernel.
    x8 = jax.random.normal(kx, (8, input_dim), jnp.float32)
    y8 = jax.block_until_ready(neural_network_forward(x8, params, force_pallas=True))
    assert y8.shape == (8, 2)
    assert jnp.allclose(y8, reference(x8), atol=1e-5, rtol=1e-5)

    # 2) Ragged batch (13 rows, 16-row block): exercises masked last-block write-back.
    x13 = jax.random.normal(kx2, (13, input_dim), jnp.float32)
    y13 = jax.block_until_ready(neural_network_forward(x13, params, force_pallas=True))
    assert y13.shape == (13, 2)
    assert jnp.allclose(y13, reference(x13), atol=1e-5, rtol=1e-5)

    # 3) Default dispatch at tiny batch takes the XLA-fusion bypass path.
    yd = jax.block_until_ready(neural_network_forward(x8, params))
    assert jnp.allclose(yd, reference(x8), atol=1e-5, rtol=1e-5)

    print("KERNEL_OK")
</pallas_src>

<mosaic_0001>
module attributes {stable_mosaic.version = 11 : i64} {
  func.func @mlp_kernel(%arg0: i32, %arg1: memref<8x32xf32, #tpu.memory_space<vmem>>, %arg2: memref<32x128xf32, #tpu.memory_space<vmem>>, %arg3: memref<1x128xf32, #tpu.memory_space<vmem>>, %arg4: memref<128x128xf32, #tpu.memory_space<vmem>>, %arg5: memref<1x128xf32, #tpu.memory_space<vmem>>, %arg6: memref<8x2xf32, #tpu.memory_space<vmem>>) attributes {dimension_semantics = [#tpu.dimension_semantics<parallel>], iteration_bounds = array<i64: 1>, scalar_prefetch = 0 : i64, scratch_operands = 0 : i64, tpu.core_type = #tpu.core_type<tc>, window_params = [{transform_indices = @transform_0, window_bounds = array<i64: 8, 32>}, {pipeline_mode = #tpu.pipeline_mode<synchronous>, transform_indices = @transform_1, window_bounds = array<i64: 32, 128>}, {pipeline_mode = #tpu.pipeline_mode<synchronous>, transform_indices = @transform_2, window_bounds = array<i64: 1, 128>}, {pipeline_mode = #tpu.pipeline_mode<synchronous>, transform_indices = @transform_3, window_bounds = array<i64: 128, 128>}, {pipeline_mode = #tpu.pipeline_mode<synchronous>, transform_indices = @transform_4, window_bounds = array<i64: 1, 128>}, {transform_indices = @transform_5, window_bounds = array<i64: 8, 2>}]} {
    %c0 = arith.constant 0 : index
    %c0_0 = arith.constant 0 : index
    %0 = vector.load %arg1[%c0, %c0_0] : memref<8x32xf32, #tpu.memory_space<vmem>>, vector<8x32xf32>
    %c0_1 = arith.constant 0 : index
    %c0_2 = arith.constant 0 : index
    %1 = vector.load %arg2[%c0_1, %c0_2] : memref<32x128xf32, #tpu.memory_space<vmem>>, vector<32x128xf32>
    %cst = arith.constant dense<0.000000e+00> : vector<8x128xf32>
    %2 = tpu.matmul %0, %1, %cst {dimension_numbers = #tpu.dot_dimension_numbers<[1], [0], [0], [1], [0, 0, 1, 1], [], []>} : vector<8x32xf32>, vector<32x128xf32>, vector<8x128xf32> -> vector<8x128xf32>
    %c0_3 = arith.constant 0 : index
    %c0_4 = arith.constant 0 : index
    %3 = vector.load %arg3[%c0_3, %c0_4] : memref<1x128xf32, #tpu.memory_space<vmem>>, vector<1x128xf32>
    %4 = vector.broadcast %3 : vector<1x128xf32> to vector<8x128xf32>
    %5 = arith.addf %2, %4 : vector<8x128xf32>
    %cst_5 = arith.constant 0.000000e+00 : f32
    %6 = vector.broadcast %cst_5 : f32 to vector<8x128xf32>
    %7 = arith.maximumf %5, %6 : vector<8x128xf32>
    %c0_6 = arith.constant 0 : index
    %c0_7 = arith.constant 0 : index
    %8 = vector.load %arg4[%c0_6, %c0_7] : memref<128x128xf32, #tpu.memory_space<vmem>>, vector<128x128xf32>
    %cst_8 = arith.constant dense<0.000000e+00> : vector<8x128xf32>
    %9 = tpu.matmul %7, %8, %cst_8 {dimension_numbers = #tpu.dot_dimension_numbers<[1], [0], [0], [1], [0, 0, 1, 1], [], []>} : vector<8x128xf32>, vector<128x128xf32>, vector<8x128xf32> -> vector<8x128xf32>
    %c0_9 = arith.constant 0 : index
    %c0_10 = arith.constant 0 : index
    %10 = vector.load %arg5[%c0_9, %c0_10] : memref<1x128xf32, #tpu.memory_space<vmem>>, vector<1x128xf32>
    %11 = vector.broadcast %10 : vector<1x128xf32> to vector<8x128xf32>
    %12 = arith.addf %9, %11 : vector<8x128xf32>
    %13 = vector.extract_strided_slice %12 {offsets = [0, 0], sizes = [8, 2], strides = [1, 1]} : vector<8x128xf32> to vector<8x2xf32>
    %c0_11 = arith.constant 0 : index
    %c0_12 = arith.constant 0 : index
    %14 = vector.load %arg6[%c0_11, %c0_12] : memref<8x2xf32, #tpu.memory_space<vmem>>, vector<8x2xf32>
    tpu.vector_store %arg6[%c0_11, %c0_12], %13 {strides = array<i32>} : memref<8x2xf32, #tpu.memory_space<vmem>>, vector<8x2xf32>,
    return
  }
  func.func @transform_0(%arg0: i32) -> (i32, i32) {
    %c0_i32 = arith.constant 0 : i32
    %c0_i32_0 = arith.constant 0 : i32
    return %arg0, %c0_i32 : i32, i32
  }
  func.func @transform_1(%arg0: i32) -> (i32, i32) {
    %c0_i32 = arith.constant 0 : i32
    %c0_i32_0 = arith.constant 0 : i32
    %c0_i32_1 = arith.constant 0 : i32
    return %c0_i32, %c0_i32_0 : i32, i32
  }
  func.func @transform_2(%arg0: i32) -> (i32, i32) {
    %c0_i32 = arith.constant 0 : i32
    %c0_i32_0 = arith.constant 0 : i32
    %c0_i32_1 = arith.constant 0 : i32
    return %c0_i32, %c0_i32_0 : i32, i32
  }
  func.func @transform_3(%arg0: i32) -> (i32, i32) {
    %c0_i32 = arith.constant 0 : i32
    %c0_i32_0 = arith.constant 0 : i32
    %c0_i32_1 = arith.constant 0 : i32
    return %c0_i32, %c0_i32_0 : i32, i32
  }
  func.func @transform_4(%arg0: i32) -> (i32, i32) {
    %c0_i32 = arith.constant 0 : i32
    %c0_i32_0 = arith.constant 0 : i32
    %c0_i32_1 = arith.constant 0 : i32
    return %c0_i32, %c0_i32_0 : i32, i32
  }
  func.func @transform_5(%arg0: i32) -> (i32, i32) {
    %c0_i32 = arith.constant 0 : i32
    %c0_i32_0 = arith.constant 0 : i32
    return %arg0, %c0_i32 : i32, i32
  }
}

</mosaic_0001>

<bundles_post_ra>
// kernel: tpu_custom_call.1
= control target key start
LH: loop header
LB: loop body
LE: loop exit
PB: predicated region body
PF: predicated region fallthrough
CT: control target
= control target key end

     0   :  { %10 = vsyncpa [#allocation3], 0  ;;  %s515_s0 = inlined_call_operand.hbm [shape: f32[8,32], index: 0, kind: input, shape index: {}]   ;;  %s516_s1 = inlined_call_operand.hbm [shape: f32[32,128], index: 1, kind: input, shape index: {}]   ;;  %s517_s2 = inlined_call_operand.vmem [shape: f32[1,128], index: 2, kind: input, shape index: {}]   ;;  %s518_s3 = inlined_call_operand.hbm [shape: f32[128,128], index: 3, kind: input, shape index: {}]   ;;  %s519_s4 = inlined_call_operand.vmem [shape: f32[1,128], index: 4, kind: input, shape index: {}]   ;;  %s520_s5 = inlined_call_operand.vmem [shape: f32[8,2], index: 5, kind: output, shape index: {}]  }
   0x1   :  { %11 = vsyncpa [#allocation5], 0  ;;  %s426_s18 = smov [#allocation4]   ;;  %s356_s22 = scalar_lea.hbm %s516_s1, 512 }
   0x2   :  { %s27_s19 = sshll.u32 %s426_s18, 4  ;;  %p357_p0 = scmp.ne.s32.totalorder %s516_s1, %s356_s22  ;;  %s28_s19 = int_to_ptr.vmem [resolvable:$true] %s27_s19 }
   0x3   :  { %p360_p1 = scmp.lt.u32.totalorder %s356_s22, %s516_s1 }
   0x5   :  { %p362_p2 = pnand %p360_p1, %p357_p0 }
   0x7   :  { %365 = shalt.err (!%p362_p2)
}
   0x8   :  { %s366_s27 = scalar_lea.vmem %s28_s19, 512  ;;  %p371_p4 = scmp.lt.s32.totalorder %s28_s19, %s28_s19 }
   0x9   :  { %p367_p3 = scmp.ne.s32.totalorder %s28_s19, %s366_s27  ;;  %p372_p5 = scmp.lt.s32.totalorder %s366_s27, %s366_s27 }
   0xb   :  { %p373_p6 = por %p372_p5, %p371_p4 }
   0xd   :  { %p374_p7 = pnand %p373_p6, %p367_p3 }
   0xf   :  { %377 = shalt.err (!%p374_p7)
}
  0x10   :  { %s427_s28 = smov 128   ;;  %s428_s29 = smov 8  }
  0x11   :  { %33 = dma.hbm_to_vmem [thread:$0]  %s516_s1, 512, %s28_s19, [#allocation5], %s427_s28, %s427_s28, %s428_s29  }
  0x12   :  { %s429_s7 = smov [#allocation2]   ;;  %s430_s9 = smov [#allocation6]  }
  0x13   :  { %s18_s8 = sshll.u32 %s429_s7, 4  ;;  %s41_s10 = sshll.u32 %s430_s9, 4  ;;  %s19_s8 = int_to_ptr.vmem [resolvable:$true] %s18_s8  ;;  %s42_s10 = int_to_ptr.vmem [resolvable:$true] %s41_s10 }
  0x14   :  { %s378_s13 = scalar_lea.hbm %s515_s0, 128 }
  0x15   :  { %p379_p8 = scmp.ne.s32.totalorder %s515_s0, %s378_s13  ;;  %p382_p9 = scmp.lt.u32.totalorder %s378_s13, %s515_s0 }
  0x17   :  { %p384_p10 = pnand %p382_p9, %p379_p8 }
  0x19   :  { %387 = shalt.err (!%p384_p10)
}
  0x1a   :  { %s388_s1 = scalar_lea.vmem %s19_s8, 128  ;;  %p393_p12 = scmp.lt.s32.totalorder %s19_s8, %s19_s8 }
  0x1b   :  { %p389_p11 = scmp.ne.s32.totalorder %s19_s8, %s388_s1  ;;  %p394_p13 = scmp.lt.s32.totalorder %s388_s1, %s388_s1 }
  0x1d   :  { %p395_p0 = por %p394_p13, %p393_p12 }
  0x1f   :  { %p396_p1 = pnand %p395_p0, %p389_p11 }
  0x21   :  { %399 = shalt.err (!%p396_p1)
}
  0x22   :  { %21 = dma.hbm_to_vmem [thread:$0]  %s515_s0, 128, %s19_s8, [#allocation3]  }
  0x23   :  { %s400_s22 = scalar_lea.hbm %s518_s3, 2048 }
  0x24   :  { %p401_p2 = scmp.ne.s32.totalorder %s518_s3, %s400_s22  ;;  %p404_p3 = scmp.lt.u32.totalorder %s400_s22, %s518_s3 }
  0x26   :  { %p406_p4 = pnand %p404_p3, %p401_p2 }
  0x28   :  { %409 = shalt.err (!%p406_p4)
}
  0x29   :  { %s410_s27 = scalar_lea.vmem %s42_s10, 2048  ;;  %p415_p6 = scmp.lt.s32.totalorder %s42_s10, %s42_s10 }
  0x2a   :  { %p411_p5 = scmp.ne.s32.totalorder %s42_s10, %s410_s27  ;;  %p416_p7 = scmp.lt.s32.totalorder %s410_s27, %s410_s27 }
  0x2c   :  { %p417_p8 = por %p416_p7, %p415_p6 }
  0x2e   :  { %p418_p9 = pnand %p417_p8, %p411_p5 }
  0x30   :  { %421 = shalt.err (!%p418_p9)
}
  0x31   :  { %47 = dma.hbm_to_vmem [thread:$0]  %s518_s3, 2048, %s42_s10, [#allocation5], %s427_s28, %s427_s28, %s428_s29  }
  0x32   :  { %422 = dma.done.wait [#allocation3], 128  }
  0x33   :  { %423 = vsyncadd [#allocation3], 4294967168 }
  0x34   :  { %424 = dma.done.wait [#allocation5], 2560  }
  0x35   :  { %425 = vsyncadd [#allocation5], 4294964736  ;;  %v431_v0 = vmov 0.0|0.0   ;;  %vm432_vm0 = vmmov 0   ;;  %v433_v1 = vmov 0.0   ;;  %v60_v2 = vld [vmem:[#allocation4] sm:$0xff] }
  0x36   :  { %318 = vmatprep.subr.bf16.mxu0 %v431_v0  ;;  %280 = vmatprep.mubr.msk.f32.mxu0 %vm432_vm0, %v433_v1  ;;  %v61_v3 = vld [vmem:[#allocation4 + $0x8] sm:$0xff]  ;;  %v62_v4 = vld [vmem:[#allocation4 + $0x10] sm:$0xff]  ;;  %v63_v6 = vld [vmem:[#allocation4 + $0x18] sm:$0xff]  ;;  %vm71_vm1 = vcmask 261120   ;;  %vm239_vm2 = vcmask 15360  }
  0x37   :  { %324 = vmatprep.subr.bf16.mxu1 %v431_v0  ;;  %315 = vmatprep.mubr.msk.f32.mxu1 %vm432_vm0, %v433_v1  ;;  %v319_v5 = vpack.c.bf16 %v61_v3, %v60_v2  ;;  %v146_v7 = vld [vmem:[#allocation6] sm:$0xff]  ;;  %v147_v8 = vld [vmem:[#allocation6 + $0x8] sm:$0xff]  ;;  %v148_v9 = vld [vmem:[#allocation6 + $0x10] sm:$0xff]  ;;  %v322_v11 = vpack.c.bf16 %v63_v6, %v62_v4 }
  0x38   :  { %v149_v10 = vld [vmem:[#allocation6 + $0x18] sm:$0xff]  ;;  %v325_v12 = vpack.c.bf16 %v147_v8, %v146_v7  ;;  %v150_v14 = vld [vmem:[#allocation6 + $0x20] sm:$0xff]  ;;  %v151_v15 = vld [vmem:[#allocation6 + $0x28] sm:$0xff] }
  0x39   :  { %320 = vmatpush3.bf16.msra.mxu0 %v319_v5  ;;  %v328_v13 = vpack.c.bf16 %v149_v10, %v148_v9  ;;  %v59_v16 = vld [vmem:[#allocation2] sm:$0xff]  ;;  %v331_v17 = vpack.c.bf16 %v151_v15, %v150_v14  ;;  %v152_v18 = vld [vmem:[#allocation6 + $0x30] sm:$0xff]  ;;  %v154_v21 = vld [vmem:[#allocation6 + $0x40] sm:$0xff] }
  0x3a   :  { %321 = vmatprep.subr.bf16.mxu0 %v431_v0  ;;  %326 = vmatpush3.bf16.msra.mxu1 %v325_v12  ;;  %v153_v19 = vld [vmem:[#allocation6 + $0x38] sm:$0xff]  ;;  %v155_v22 = vld [vmem:[#allocation6 + $0x48] sm:$0xff]  ;;  %v156_v24 = vld [vmem:[#allocation6 + $0x50] sm:$0xff] }
  0x3b   :  { %327 = vmatprep.subr.bf16.mxu1 %v431_v0  ;;  %v334_v20 = vpack.c.bf16 %v153_v19, %v152_v18  ;;  %v337_v23 = vpack.c.bf16 %v155_v22, %v154_v21  ;;  %v157_v25 = vld [vmem:[#allocation6 + $0x58] sm:$0xff]  ;;  %v158_v27 = vld [vmem:[#allocation6 + $0x60] sm:$0xff]  ;;  %v159_v28 = vld [vmem:[#allocation6 + $0x68] sm:$0xff] }
  0x3c   :  { %v340_v26 = vpack.c.bf16 %v157_v25, %v156_v24  ;;  %v343_v29 = vpack.c.bf16 %v159_v28, %v158_v27  ;;  %v160_v30 = vld [vmem:[#allocation6 + $0x70] sm:$0xff]  ;;  %v161_v31 = vld [vmem:[#allocation6 + $0x78] sm:$0xff] }
  0x3d   :  { %323 = vmatpush3.bf16.msra.mxu0 %v322_v11  ;;  %v346_v32 = vpack.c.bf16 %v161_v31, %v160_v30  ;;  %v247_v33 = vld [vmem:[%s517_s2] ss:$0 sm:$0xff] }
  0x3e   :  { %329 = vmatpush3.bf16.msra.mxu1 %v328_v13  ;;  %v249_v38 = vld [vmem:[%s519_s4] ss:$0 sm:$0xff] }
  0x3f   :  { %330 = vmatprep.subr.bf16.mxu1 %v431_v0 }
  0x40   :  { %281 = vmatmul.mubr.msk.f32.vlgmr.msra.gmra.mrb[0].mxu0 %vm71_vm1, %v59_v16 }
  0x42   :  { %332 = vmatpush3.bf16.msra.mxu1 %v331_v17 }
  0x43   :  { %333 = vmatprep.subr.bf16.mxu1 %v431_v0 }
  0x46   :  { %335 = vmatpush3.bf16.msra.mxu1 %v334_v20 }
  0x47   :  { %336 = vmatprep.subr.bf16.mxu1 %v431_v0 }
  0x4a   :  { %338 = vmatpush3.bf16.msra.mxu1 %v337_v23 }
  0x4b   :  { %339 = vmatprep.subr.bf16.mxu1 %v431_v0 }
  0x4e   :  { %341 = vmatpush3.bf16.msra.mxu1 %v340_v26 }
  0x4f   :  { %342 = vmatprep.subr.bf16.mxu1 %v431_v0 }
  0x52   :  { %344 = vmatpush3.bf16.msra.mxu1 %v343_v29 }
  0x53   :  { %345 = vmatprep.subr.bf16.mxu1 %v431_v0 }
  0x56   :  { %347 = vmatpush3.bf16.msra.mxu1 %v346_v32 }
 0x113   :  { %v141_v34 = vpop.f32.mrb[0].mxu0 }
 0x114   :  { %v142_v35 = vadd.f32 %v247_v33, %v141_v34  ;;  %v282_v36 = vpop.f32.mrb[1].mxu0 }
 0x116   :  { %v145_v37 = vmax.f32 %v142_v35, 0.0 }
 0x118   :  { %316 = vmatmul.mubr.f32.vlgmr.msra.gmra.mrb[0].mxu1 %v145_v37 }
 0x1eb   :  { %v235_v39 = vpop.f32.mrb[0].mxu1 }
 0x1ec   :  { %v236_v40 = vadd.f32 %v249_v38, %v235_v39  ;;  %v317_v41 = vpop.f32.mrb[1].mxu1 }
 0x1ee   :  { %240 = vst.msk [vmem:[%s520_s5] sm:$0xff] %vm239_vm2, %v236_v40 }
 0x1ef   :  { %245 = vsyncpa [#allocation3], 1 }
 0x1f0   :  { %246 = vsyncpa [#allocation5], 1 }

</bundles_post_ra>
